<compile_context>
chip_gen: v6e
topology: v6e:2x2x1
jax: 0.10.0
libtpu: 0.0.40
codegen_flags: <defaults>
</compile_context>

<pallas_src>
import functools

import jax
import jax.numpy as jnp
from jax.experimental import pallas as pl
from jax.experimental.pallas import tpu as pltpu

IN_FEATURES = 5
OUT_FEATURES = 5


def _round_up(n, m):
    return ((n + m - 1) // m) * m


def _linear_kernel(x_ref, w_ref, b_ref, o_ref):
    # x_ref: (bm, IN)   w_ref: (IN, OUT) [pre-transposed]   b_ref: (1, OUT)
    # Kernel is HBM-bound; do the 5x5 "matmul" as 5 broadcast-FMAs on the VPU
    # (otherwise-idle VALU slots) instead of a <0.2%-utilized MXU pass.
    x = x_ref[...].astype(jnp.float32)
    w = w_ref[...].astype(jnp.float32)
    y = jnp.broadcast_to(b_ref[...].astype(jnp.float32),
                         (x.shape[0], OUT_FEATURES))
    for k in range(IN_FEATURES):  # static unroll, 5 iterations
        y = y + x[:, k:k + 1] * w[k:k + 1, :]
    o_ref[...] = y.astype(o_ref.dtype)


@functools.partial(jax.jit, static_argnames=("block_rows",))
def linear_forward(x, weight, bias, *, block_rows=8192):
    """Pallas y = x @ weight.T + bias.

    x: (B, IN) or (IN,)    weight: (OUT, IN) (PyTorch layout)    bias: (OUT,)
    """
    squeeze = x.ndim == 1
    x2d = x.reshape(1, -1) if squeeze else x
    B = x2d.shape[0]

    # Pre-transpose once at trace time (fuses under jit); kernel sees (IN, OUT).
    w_t = weight.T
    b2d = bias.reshape(1, -1)

    if B <= 8:
        # Tiny batch (the spec case B=1): one full-extent block, no grid
        # overhead; full-array block shape satisfies the (8,128) rule.
        bm = B
    else:
        # Splittable batch: at least 2 tiles (v7x megacore), block rows a
        # multiple of 8 (sublane constraint), capped by block_rows.
        bm = min(_round_up(block_rows, 8), _round_up(pl.cdiv(B, 2), 8))
    num_tiles = pl.cdiv(B, bm)

    itemsize = jnp.dtype(x2d.dtype).itemsize
    cost = pl.CostEstimate(
        flops=2 * B * IN_FEATURES * OUT_FEATURES,
        transcendentals=0,
        bytes_accessed=(x2d.size + w_t.size + b2d.size + B * OUT_FEATURES)
        * itemsize,
    )

    out = pl.pallas_call(
        _linear_kernel,
        out_shape=jax.ShapeDtypeStruct((B, OUT_FEATURES), x2d.dtype),
        grid=(num_tiles,),
        in_specs=[
            # x: tiled over batch; ragged final block handled by Pallas.
            pl.BlockSpec((bm, IN_FEATURES), lambda i: (i, 0),
                         memory_space=pltpu.MemorySpace.VMEM),
            # weight (pre-transposed) and bias: same block every grid step ->
            # VMEM-resident, fetched once.
            pl.BlockSpec((IN_FEATURES, OUT_FEATURES), lambda i: (0, 0),
                         memory_space=pltpu.MemorySpace.VMEM),
            pl.BlockSpec((1, OUT_FEATURES), lambda i: (0, 0),
                         memory_space=pltpu.MemorySpace.VMEM),
        ],
        out_specs=pl.BlockSpec((bm, OUT_FEATURES), lambda i: (i, 0),
                               memory_space=pltpu.MemorySpace.VMEM),
        compiler_params=pltpu.CompilerParams(
            dimension_semantics=("parallel",),
            vmem_limit_bytes=32 << 20,
        ),
        cost_estimate=cost,
    )(x2d, w_t, b2d)

    return out[0] if squeeze else out


def init_params(key):
    """Deterministic init mimicking nn.Linear's U(-1/sqrt(in), 1/sqrt(in))."""
    k_w, k_b = jax.random.split(key)
    bound = 1.0 / jnp.sqrt(jnp.float32(IN_FEATURES))
    weight = jax.random.uniform(
        k_w, (OUT_FEATURES, IN_FEATURES), jnp.float32, -bound, bound
    )
    bias = jax.random.uniform(k_b, (OUT_FEATURES,), jnp.float32, -bound, bound)
    return weight, bias


if __name__ == "__main__":
    key = jax.random.PRNGKey(0)
    weight, bias = init_params(key)

    # Case 1: matches the PyTorch script exactly — x = torch.ones(5).
    x1 = jnp.ones((IN_FEATURES,), dtype=jnp.float32)
    y1 = jax.block_until_ready(linear_forward(x1, weight, bias))
    y1_ref = x1 @ weight.T + bias
    assert y1.shape == (OUT_FEATURES,)
    assert jnp.allclose(y1, y1_ref, atol=1e-5), (y1, y1_ref)

    # Case 2: small batch, default block_rows -> bm=16, grid of 2 tiles with a
    # ragged (masked-write) final block — no host-side pad or output slice.
    xb = jax.random.normal(jax.random.PRNGKey(1), (20, IN_FEATURES), jnp.float32)
    yb = jax.block_until_ready(linear_forward(xb, weight, bias))
    yb_ref = xb @ weight.T + bias
    assert yb.shape == (20, OUT_FEATURES)
    assert jnp.allclose(yb, yb_ref, atol=1e-5), (yb, yb_ref)

    # Case 3: explicit small block_rows -> bm=8, 3 tiles, last tile ragged.
    yc = jax.block_until_ready(linear_forward(xb, weight, bias, block_rows=8))
    assert jnp.allclose(yc, yb_ref, atol=1e-5), (yc, yb_ref)

    print("KERNEL_OK")
</pallas_src>

<mosaic_0001>
module attributes {stable_mosaic.version = 11 : i64} {
  func.func @_linear_kernel(%arg0: i32, %arg1: memref<1x5xf32, #tpu.memory_space<vmem>>, %arg2: memref<5x5xf32, #tpu.memory_space<vmem>>, %arg3: memref<1x5xf32, #tpu.memory_space<vmem>>, %arg4: memref<1x5xf32, #tpu.memory_space<vmem>>) attributes {dimension_semantics = [#tpu.dimension_semantics<parallel>], iteration_bounds = array<i64: 1>, scalar_prefetch = 0 : i64, scratch_operands = 0 : i64, tpu.core_type = #tpu.core_type<tc>, window_params = [{transform_indices = @transform_0, window_bounds = array<i64: 1, 5>}, {pipeline_mode = #tpu.pipeline_mode<synchronous>, transform_indices = @transform_1, window_bounds = array<i64: 5, 5>}, {pipeline_mode = #tpu.pipeline_mode<synchronous>, transform_indices = @transform_2, window_bounds = array<i64: 1, 5>}, {transform_indices = @transform_3, window_bounds = array<i64: 1, 5>}]} {
    %c0 = arith.constant 0 : index
    %c0_0 = arith.constant 0 : index
    %0 = vector.load %arg1[%c0, %c0_0] : memref<1x5xf32, #tpu.memory_space<vmem>>, vector<1x5xf32>
    %c0_1 = arith.constant 0 : index
    %c0_2 = arith.constant 0 : index
    %1 = vector.load %arg2[%c0_1, %c0_2] : memref<5x5xf32, #tpu.memory_space<vmem>>, vector<5x5xf32>
    %c0_3 = arith.constant 0 : index
    %c0_4 = arith.constant 0 : index
    %2 = vector.load %arg3[%c0_3, %c0_4] : memref<1x5xf32, #tpu.memory_space<vmem>>, vector<1x5xf32>
    %3 = vector.extract_strided_slice %0 {offsets = [0, 0], sizes = [1, 1], strides = [1, 1]} : vector<1x5xf32> to vector<1x1xf32>
    %4 = vector.extract_strided_slice %1 {offsets = [0, 0], sizes = [1, 5], strides = [1, 1]} : vector<5x5xf32> to vector<1x5xf32>
    %5 = vector.broadcast %3 : vector<1x1xf32> to vector<1x5xf32>
    %6 = arith.mulf %5, %4 : vector<1x5xf32>
    %7 = arith.addf %2, %6 : vector<1x5xf32>
    %8 = vector.extract_strided_slice %0 {offsets = [0, 1], sizes = [1, 1], strides = [1, 1]} : vector<1x5xf32> to vector<1x1xf32>
    %9 = vector.extract_strided_slice %1 {offsets = [1, 0], sizes = [1, 5], strides = [1, 1]} : vector<5x5xf32> to vector<1x5xf32>
    %10 = vector.broadcast %8 : vector<1x1xf32> to vector<1x5xf32>
    %11 = arith.mulf %10, %9 : vector<1x5xf32>
    %12 = arith.addf %7, %11 : vector<1x5xf32>
    %13 = vector.extract_strided_slice %0 {offsets = [0, 2], sizes = [1, 1], strides = [1, 1]} : vector<1x5xf32> to vector<1x1xf32>
    %14 = vector.extract_strided_slice %1 {offsets = [2, 0], sizes = [1, 5], strides = [1, 1]} : vector<5x5xf32> to vector<1x5xf32>
    %15 = vector.broadcast %13 : vector<1x1xf32> to vector<1x5xf32>
    %16 = arith.mulf %15, %14 : vector<1x5xf32>
    %17 = arith.addf %12, %16 : vector<1x5xf32>
    %18 = vector.extract_strided_slice %0 {offsets = [0, 3], sizes = [1, 1], strides = [1, 1]} : vector<1x5xf32> to vector<1x1xf32>
    %19 = vector.extract_strided_slice %1 {offsets = [3, 0], sizes = [1, 5], strides = [1, 1]} : vector<5x5xf32> to vector<1x5xf32>
    %20 = vector.broadcast %18 : vector<1x1xf32> to vector<1x5xf32>
    %21 = arith.mulf %20, %19 : vector<1x5xf32>
    %22 = arith.addf %17, %21 : vector<1x5xf32>
    %23 = vector.extract_strided_slice %0 {offsets = [0, 4], sizes = [1, 1], strides = [1, 1]} : vector<1x5xf32> to vector<1x1xf32>
    %24 = vector.extract_strided_slice %1 {offsets = [4, 0], sizes = [1, 5], strides = [1, 1]} : vector<5x5xf32> to vector<1x5xf32>
    %25 = vector.broadcast %23 : vector<1x1xf32> to vector<1x5xf32>
    %26 = arith.mulf %25, %24 : vector<1x5xf32>
    %27 = arith.addf %22, %26 : vector<1x5xf32>
    %c0_5 = arith.constant 0 : index
    %c0_6 = arith.constant 0 : index
    %28 = vector.load %arg4[%c0_5, %c0_6] : memref<1x5xf32, #tpu.memory_space<vmem>>, vector<1x5xf32>
    tpu.vector_store %arg4[%c0_5, %c0_6], %27 {strides = array<i32>} : memref<1x5xf32, #tpu.memory_space<vmem>>, vector<1x5xf32>,
    return
  }
  func.func @transform_0(%arg0: i32) -> (i32, i32) {
    %c0_i32 = arith.constant 0 : i32
    %c0_i32_0 = arith.constant 0 : i32
    return %arg0, %c0_i32 : i32, i32
  }
  func.func @transform_1(%arg0: i32) -> (i32, i32) {
    %c0_i32 = arith.constant 0 : i32
    %c0_i32_0 = arith.constant 0 : i32
    %c0_i32_1 = arith.constant 0 : i32
    return %c0_i32, %c0_i32_0 : i32, i32
  }
  func.func @transform_2(%arg0: i32) -> (i32, i32) {
    %c0_i32 = arith.constant 0 : i32
    %c0_i32_0 = arith.constant 0 : i32
    %c0_i32_1 = arith.constant 0 : i32
    return %c0_i32, %c0_i32_0 : i32, i32
  }
  func.func @transform_3(%arg0: i32) -> (i32, i32) {
    %c0_i32 = arith.constant 0 : i32
    %c0_i32_0 = arith.constant 0 : i32
    return %arg0, %c0_i32 : i32, i32
  }
}

</mosaic_0001>

<bundles_post_ra>
// kernel: linear_forward.1
= control target key start
LH: loop header
LB: loop body
LE: loop exit
PB: predicated region body
PF: predicated region fallthrough
CT: control target
= control target key end

     0   :  { %v189_v1 = vmov 3   ;;  %v190_v2 = vmov 1   ;;  %s228_s0 = inlined_call_operand.vmem [shape: f32[1,5], index: 0, kind: input, shape index: {}]   ;;  %s229_s1 = inlined_call_operand.vmem [shape: f32[5,5], index: 1, kind: input, shape index: {}]   ;;  %s230_s2 = inlined_call_operand.vmem [shape: f32[1,5], index: 2, kind: input, shape index: {}]   ;;  %s231_s3 = inlined_call_operand.hbm [shape: f32[1,5], index: 3, kind: output, shape index: {}]  }
   0x1   :  { %v15_v0 = vld [vmem:[%s228_s0] sm:$0x1]  ;;  %163 = vset.pattern.permute.xlu1 %v189_v1  ;;  %161 = vset.pattern.permute.xlu0 %v190_v2 }
   0x2   :  { %84 = vperm.xlu1 %163, %v15_v0   ;;  %30 = vperm.xlu0 %161, %v15_v0  }
   0x3   :  { %8 = vsyncpa [#allocation3], 0  ;;  %v191_v3 = vmov 0   ;;  %v192_v4 = vmov 2   ;;  %v193_v5 = vmov 4   ;;  %v23_v6 = vlaneseq }
   0x4   :  { %v194_v8 = vmov 1966171168   ;;  %v16_v12 = vld [vmem:[%s229_s1] sm:$0x1f]  ;;  %s195_s1 = smov [#allocation2]   ;;  %vm138_vm0 = vcmask 32768  }
   0x5   :  { %v24_v7 = vshrl.u32 %v23_v6, 7  ;;  %v40_v9 = vunpack.c.l.s4 %v194_v8  ;;  %v17_v27 = vld [vmem:[%s230_s2] sm:$0x1]  ;;  %s146_s2 = sshll.u32 %s195_s1, 4  ;;  %s147_s2 = int_to_ptr.vmem [resolvable:$true] %s146_s2 }
   0x6   :  { %164 = vset.pattern.permute.xlu1 %v191_v3  ;;  %162 = vset.pattern.permute.xlu0 %v192_v4  ;;  %s167_s17 = scalar_lea.vmem %s147_s2, 16  ;;  %s171_s18 = scalar_lea.vmem %s147_s2, 32 }
   0x7   :  { %20 = vperm.xlu1 %164, %v15_v0   ;;  %57 = vperm.xlu0 %162, %v15_v0   ;;  %v25_v10 = vsub.s32 0, %v24_v7  ;;  %v41_v11 = vunpack.c.0.s8 %v40_v9  ;;  %p168_p0 = scmp.ne.s32.totalorder %s147_s2, %s167_s17  ;;  %p172_p1 = scmp.lt.s32.totalorder %s147_s2, %s147_s2 }
   0x8   :  { %p173_p2 = scmp.lt.s32.totalorder %s171_s18, %s167_s17 }
   0x9   :  { %v44_v15 = vsub.s32 %v41_v11, %v24_v7 }
   0xa   :  { %p174_p3 = por %p173_p2, %p172_p1 }
   0xb   :  { %165 = vset.pattern.permute.xlu1 %v193_v5  ;;  %166 = vset.pattern.permute.xlu0 %v193_v5 }
   0xc   :  { %112 = vperm.xlu1 %165, %v15_v0   ;;  %p175_p4 = pnand %p174_p3, %p168_p0 }
  0x7d   :  { %v85_v13 = vpop.permute.xlu1 %84  ;;  %v31_v14 = vpop.permute.xlu0 %30 }
  0x7e   :  { %v90_v16 = vrot.slane %v85_v13, %v25_v10  ;;  %v36_v17 = vrot.slane %v31_v14, %v25_v10 }
  0x80   :  { %v91_v18 = vmul.f32 %v90_v16, %v16_v12  ;;  %v37_v19 = vmul.f32 %v36_v17, %v16_v12 }
  0x82   :  { %v99_v20 = vrot.slane %v91_v18, %v44_v15  ;;  %v45_v21 = vrot.slane %v37_v19, %v44_v15  ;;  %v21_v22 = vpop.permute.xlu1 %20  ;;  %v58_v23 = vpop.permute.xlu0 %57 }
  0x83   :  { %v26_v24 = vrot.slane %v21_v22, %v25_v10  ;;  %v63_v25 = vrot.slane %v58_v23, %v25_v10 }
  0x84   :  { %v46_v26 = vcombine.high %v45_v21, %v45_v21  ;;  %v100_v28 = vcombine.high %v99_v20, %v99_v20 }
  0x85   :  { %v27_v29 = vmul.f32 %v26_v24, %v16_v12  ;;  %v64_v30 = vmul.f32 %v63_v25, %v16_v12 }
  0x86   :  { %v53_v31 = vrot.slane %v46_v26, %v44_v15  ;;  %v107_v36 = vrot.slane %v100_v28, %v44_v15 }
  0x87   :  { %v28_v32 = vadd.f32 %v27_v29, %v17_v27  ;;  %v72_v33 = vrot.slane %v64_v30, %v44_v15  ;;  %v113_v34 = vpop.permute.xlu1 %112 }
  0x88   :  { %v118_v35 = vrot.slane %v113_v34, %v25_v10  ;;  %v108_v42 = vcombine.high %v107_v36, %v107_v36 }
  0x89   :  { %v79_v37 = vrot.slane %v72_v33, %v44_v15  ;;  %v55_v39 = vadd.f32 %v53_v31, %v28_v32 }
  0x8a   :  { %v119_v38 = vmul.f32 %v118_v35, %v16_v12 }
  0x8b   :  { %v80_v40 = vcombine.high %v79_v37, %v79_v37 }
  0x8c   :  { %v121_v41 = vcombine.high %v119_v38, %v119_v38 }
  0x8d   :  { %v82_v43 = vadd.f32 %v80_v40, %v55_v39 }
  0x8e   :  { %v128_v44 = vrot.slane %v121_v41, %v44_v15 }
  0x8f   :  { %v110_v45 = vadd.f32 %v108_v42, %v82_v43 }
  0x90   :  { %v135_v46 = vrot.slane %v128_v44, %v44_v15 }
  0x92   :  { %v137_v47 = vadd.f32 %v135_v46, %v110_v45 }
  0x94   :  { %139 = vst.msk [vmem:[#allocation2] sm:$0x1] %vm138_vm0, %v137_v47 }
  0x95   :  { %178 = shalt.err (!%p175_p4)
}
  0x96   :  { %149 = dma.vmem_to_hbm [thread:$0]  %s147_s2, 16, %s231_s3, [#allocation3]  }
  0x97   :  { %187 = dma.done.wait [#allocation3], 16  }
  0x98   :  { %188 = vsyncadd [#allocation3], 4294967280 }
  0x99   :  { %153 = vsyncpa [#allocation3], 1 }

</bundles_post_ra>
